<compile_context>
chip_gen: v7x
topology: tpu7x:2x2x1
jax: 0.10.0
libtpu: 0.0.40
codegen_flags: <defaults>
</compile_context>

<pallas_src>
import functools

import jax
import jax.numpy as jnp
from jax import lax
from jax.experimental import pallas as pl
from jax.experimental.pallas import tpu as pltpu


def _wce_kernel(logits_ref, tgt_ref, w_ref, out_ref, *, hw):
    """One grid step = one (batch block, pixel tile).

    logits_ref: (BB, C, TN)  native dtype  -- class logits, pixels on lanes
    tgt_ref:    (BB, 1, TN)  int32         -- target class per pixel
    w_ref:      (1,  C, 1)   float32       -- per-class weights
    out_ref:    (1,  1, TN)  float32       -- per-batch-block lane partial sums
    """
    pi = pl.program_id(1)

    x = logits_ref[...].astype(jnp.float32)             # (BB, C, TN)
    t = tgt_ref[...]                                     # (BB, 1, TN) int32
    wv = w_ref[...].astype(jnp.float32)                  # (1,  C, 1)
    bb, c, tn = x.shape

    # Packed class reduction: classes live on the sublane axis (XLU reduces),
    # pixels stay lane-dense (pure VPU elementwise elsewhere).
    m = jnp.max(x, axis=1, keepdims=True)                               # (BB,1,TN)
    lse = m + jnp.log(jnp.sum(jnp.exp(x - m), axis=1, keepdims=True))   # (BB,1,TN)

    cid = lax.broadcasted_iota(jnp.int32, (1, c, 1), 1)
    onehot = t == cid                                                   # (BB,C,TN)
    logit_t = jnp.sum(jnp.where(onehot, x, 0.0), axis=1, keepdims=True)
    wpix = jnp.sum(jnp.where(onehot, wv, 0.0), axis=1, keepdims=True)

    contrib = wpix * (lse - logit_t)                                    # (BB,1,TN)

    # Ragged last pixel tile (only emitted when TILE_N does not divide H*W):
    # mask out-of-range lanes so OOB-padded logits never contribute.
    if hw % tn != 0:
        pix = pi * tn + lax.broadcasted_iota(jnp.int32, (1, 1, tn), 2)
        contrib = jnp.where(pix < hw, contrib, 0.0)

    partial = jnp.sum(contrib, axis=0, keepdims=True)                   # (1,1,TN)

    # Resident output block across the (arbitrary) pixel axis: init then accumulate.
    @pl.when(pi == 0)
    def _():
        out_ref[...] = jnp.zeros_like(out_ref)

    out_ref[...] += partial


def _vmem_capacity_bytes():
    """Physical VMEM of the local TPU, with a conservative fallback (v7x = 64 MiB)."""
    try:
        info = pltpu.get_tpu_info()
        for name in ("vmem_capacity_bytes", "vmem_size_bytes", "vmem_bytes"):
            v = getattr(info, name, None)
            if v:
                return int(v)
    except Exception:
        pass
    return 64 * 1024 * 1024


def weighted_cross_entropy_loss(outputs, targets, class_weights, *, max_tile=512 * 1024):
    """outputs: (B, C, H, W) float, targets: (B, H, W) int, class_weights: (C,) float.

    Matches the PyTorch module: mean over ALL pixels of weights[target] * CE(pixel).
    """
    b, c, h, w = outputs.shape
    hw = h * w
    n_total = b * hw

    # Free views of the native NCHW layout: no transpose, no cast of the big tensor.
    # (If upstream can emit bf16 logits, the kernel consumes them directly and does
    #  f32 math in-VMEM -- halves HBM traffic; do NOT add a standalone cast pass.)
    logits = outputs.reshape(b, c, hw)
    tgt = targets.reshape(b, 1, hw).astype(jnp.int32)       # no-op for int32 targets
    wvec = class_weights.reshape(1, c, 1).astype(jnp.float32)

    # Generation-aware VMEM sizing.
    vmem_phys = _vmem_capacity_bytes()
    vmem_budget = vmem_phys // 4                             # per-step working set
    vmem_limit = min(3 * vmem_phys // 4, 64 * 1024 * 1024)   # scoped limit

    itemsize = jnp.dtype(outputs.dtype).itemsize
    c_pad = ((c + 7) // 8) * 8
    # Per-pixel working set, INCLUDING in-kernel f32 temporaries (f32 cast of x,
    # exp(x-m), one-hot/where products) which the DMA-only estimate misses.
    per_px = (c_pad * itemsize * 2        # logits block, double-buffered
              + 3 * c_pad * 4             # f32 temporaries inside the kernel
              + 8 * 4 * 2                 # int32 targets (sublane-padded 1->8), double-buffered
              + 8 * 4 * 2)                # f32 output block (sublane-padded), double-buffered
    tile_budget = max(128, vmem_budget // per_px)

    if hw <= tile_budget:
        tile_n = hw                        # full-extent pixel block (always legal)
        n_ptiles = 1
    else:
        tile_n = min(max_tile, tile_budget)
        tile_n = max(128, (tile_n // 128) * 128)
        n_ptiles = pl.cdiv(hw, tile_n)

    # Small-image case: pack several batch images per grid step to amortize the
    # ~0.35us per-step overhead, but keep >=2 batch blocks so the "parallel" batch
    # axis can still be sharded across both v7x TensorCores.
    bb = 1
    if n_ptiles == 1 and b > 1:
        bb_max = max(1, min(tile_budget // max(hw, 1), b // 2))
        for d in range(min(bb_max, b), 0, -1):
            if b % d == 0:
                bb = d
                break
    nb = b // bb

    kernel = functools.partial(_wce_kernel, hw=hw)

    cost = pl.CostEstimate(
        flops=int(5 * n_total * c),
        transcendentals=int(n_total * (c + 1)),
        bytes_accessed=int(n_total * c * itemsize + n_total * 4 + nb * tile_n * 4),
    )

    partials = pl.pallas_call(
        kernel,
        out_shape=jax.ShapeDtypeStruct((nb, 1, tile_n), jnp.float32),
        grid_spec=pltpu.PrefetchScalarGridSpec(
            num_scalar_prefetch=0,
            grid=(nb, n_ptiles),
            in_specs=[
                pl.BlockSpec((bb, c, tile_n), lambda bi, pi: (bi, 0, pi)),
                pl.BlockSpec((bb, 1, tile_n), lambda bi, pi: (bi, 0, pi)),
                pl.BlockSpec((1, c, 1), lambda bi, pi: (0, 0, 0)),
            ],
            out_specs=pl.BlockSpec((1, 1, tile_n), lambda bi, pi: (bi, 0, 0)),
        ),
        compiler_params=pltpu.CompilerParams(
            dimension_semantics=("parallel", "arbitrary"),
            vmem_limit_bytes=vmem_limit,
        ),
        cost_estimate=cost,
    )(logits, tgt, wvec)

    # Tiny epilogue outside the kernel: sum lane partials, normalize by B*H*W.
    return jnp.sum(partials) / jnp.float32(n_total)


def _reference(outputs, targets, class_weights):
    """Pure-JAX reference matching the PyTorch module semantics."""
    logp = jax.nn.log_softmax(outputs.astype(jnp.float32), axis=1)  # (B,C,H,W)
    onehot = jax.nn.one_hot(targets, outputs.shape[1], axis=1, dtype=jnp.float32)
    ce = -jnp.sum(onehot * logp, axis=1)                            # (B,H,W)
    wt = class_weights[targets]                                     # (B,H,W)
    return jnp.mean(wt * ce)


if __name__ == "__main__":
    B, C, H, W = 2, 4, 16, 16
    key = jax.random.PRNGKey(0)
    k1, k2, k3 = jax.random.split(key, 3)

    outputs = jax.random.normal(k1, (B, C, H, W), dtype=jnp.float32)
    targets = jax.random.randint(k2, (B, H, W), 0, C, dtype=jnp.int32)
    # deterministic synthetic per-class weights (the module's __init__ arg)
    class_weights = jax.random.uniform(k3, (C,), dtype=jnp.float32, minval=0.5, maxval=2.0)

    loss = jax.block_until_ready(
        weighted_cross_entropy_loss(outputs, targets, class_weights)
    )
    ref = _reference(outputs, targets, class_weights)
    assert jnp.allclose(loss, ref, rtol=1e-5, atol=1e-5), (loss, ref)
    print("KERNEL_OK")
</pallas_src>

<mosaic_0001>
module attributes {stable_mosaic.version = 11 : i64} {
  func.func @_wce_kernel(%arg0: i32, %arg1: i32, %arg2: memref<1x4x256xf32, #tpu.memory_space<vmem>>, %arg3: memref<1x1x256xi32, #tpu.memory_space<vmem>>, %arg4: memref<1x4x1xf32, #tpu.memory_space<vmem>>, %arg5: memref<1x1x256xf32, #tpu.memory_space<vmem>>) attributes {dimension_semantics = [#tpu.dimension_semantics<parallel>, #tpu.dimension_semantics<arbitrary>], iteration_bounds = array<i64: 2, 1>, scalar_prefetch = 0 : i64, scratch_operands = 0 : i64, tpu.core_type = #tpu.core_type<tc>, window_params = [{transform_indices = @transform_0, window_bounds = array<i64: 1, 4, 256>}, {transform_indices = @transform_1, window_bounds = array<i64: 1, 1, 256>}, {pipeline_mode = #tpu.pipeline_mode<synchronous>, transform_indices = @transform_2, window_bounds = array<i64: 1, 4, 1>}, {transform_indices = @transform_3, window_bounds = array<i64: 1, 1, 256>}]} {
    %c0 = arith.constant 0 : index
    %c0_0 = arith.constant 0 : index
    %c0_1 = arith.constant 0 : index
    %0 = vector.load %arg2[%c0, %c0_0, %c0_1] : memref<1x4x256xf32, #tpu.memory_space<vmem>>, vector<1x4x256xf32>
    %c0_2 = arith.constant 0 : index
    %c0_3 = arith.constant 0 : index
    %c0_4 = arith.constant 0 : index
    %1 = vector.load %arg3[%c0_2, %c0_3, %c0_4] : memref<1x1x256xi32, #tpu.memory_space<vmem>>, vector<1x1x256xi32>
    %c0_5 = arith.constant 0 : index
    %c0_6 = arith.constant 0 : index
    %c0_7 = arith.constant 0 : index
    %2 = vector.load %arg4[%c0_5, %c0_6, %c0_7] : memref<1x4x1xf32, #tpu.memory_space<vmem>>, vector<1x4x1xf32>
    %cst = arith.constant dense<0xFF800000> : vector<1x256xf32>
    %3 = vector.multi_reduction <maximumf>, %0, %cst [1] : vector<1x4x256xf32> to vector<1x256xf32>
    %4 = vector.shape_cast %3 : vector<1x256xf32> to vector<1x1x256xf32>
    %5 = vector.broadcast %4 : vector<1x1x256xf32> to vector<1x4x256xf32>
    %6 = arith.subf %0, %5 : vector<1x4x256xf32>
    %7 = math.exp %6 : vector<1x4x256xf32>
    %cst_8 = arith.constant dense<0.000000e+00> : vector<1x256xf32>
    %8 = vector.multi_reduction <add>, %7, %cst_8 [1] : vector<1x4x256xf32> to vector<1x256xf32>
    %9 = vector.shape_cast %8 : vector<1x256xf32> to vector<1x1x256xf32>
    %10 = math.log %9 : vector<1x1x256xf32>
    %11 = arith.addf %4, %10 : vector<1x1x256xf32>
    %12 = tpu.iota {dimensions = array<i32: 1>} : vector<1x4x1xi32>
    %13 = vector.broadcast %1 : vector<1x1x256xi32> to vector<1x4x256xi32>
    %14 = vector.broadcast %12 : vector<1x4x1xi32> to vector<1x4x256xi32>
    %15 = arith.cmpi eq, %13, %14 : vector<1x4x256xi32>
    %cst_9 = arith.constant 0.000000e+00 : f32
    %16 = vector.broadcast %cst_9 : f32 to vector<1x4x256xf32>
    %17 = arith.select %15, %0, %16 : vector<1x4x256xi1>, vector<1x4x256xf32>
    %cst_10 = arith.constant dense<0.000000e+00> : vector<1x256xf32>
    %18 = vector.multi_reduction <add>, %17, %cst_10 [1] : vector<1x4x256xf32> to vector<1x256xf32>
    %19 = vector.shape_cast %18 : vector<1x256xf32> to vector<1x1x256xf32>
    %cst_11 = arith.constant 0.000000e+00 : f32
    %20 = vector.shape_cast %2 : vector<1x4x1xf32> to vector<1x4x1xf32>
    %21 = vector.broadcast %20 : vector<1x4x1xf32> to vector<1x4x256xf32>
    %22 = vector.broadcast %cst_11 : f32 to vector<1x4x256xf32>
    %23 = arith.select %15, %21, %22 : vector<1x4x256xi1>, vector<1x4x256xf32>
    %cst_12 = arith.constant dense<0.000000e+00> : vector<1x256xf32>
    %24 = vector.multi_reduction <add>, %23, %cst_12 [1] : vector<1x4x256xf32> to vector<1x256xf32>
    %25 = vector.shape_cast %24 : vector<1x256xf32> to vector<1x1x256xf32>
    %26 = arith.subf %11, %19 : vector<1x1x256xf32>
    %27 = arith.mulf %25, %26 : vector<1x1x256xf32>
    %cst_13 = arith.constant dense<0.000000e+00> : vector<1x256xf32>
    %28 = vector.multi_reduction <add>, %27, %cst_13 [0] : vector<1x1x256xf32> to vector<1x256xf32>
    %29 = vector.shape_cast %28 : vector<1x256xf32> to vector<1x1x256xf32>
    %c0_i32 = arith.constant 0 : i32
    %30 = arith.cmpi eq, %arg1, %c0_i32 : i32
    %31 = arith.extui %30 : i1 to i32
    %c0_i32_14 = arith.constant 0 : i32
    %32 = arith.cmpi ne, %31, %c0_i32_14 : i32
    scf.if %32 {
      %cst_21 = arith.constant 0.000000e+00 : f32
      %36 = vector.broadcast %cst_21 : f32 to vector<1x1x256xf32>
      %c0_22 = arith.constant 0 : index
      %c0_23 = arith.constant 0 : index
      %c0_24 = arith.constant 0 : index
      %37 = vector.load %arg5[%c0_22, %c0_23, %c0_24] : memref<1x1x256xf32, #tpu.memory_space<vmem>>, vector<1x1x256xf32>
      tpu.vector_store %arg5[%c0_22, %c0_23, %c0_24], %36 {strides = array<i32>} : memref<1x1x256xf32, #tpu.memory_space<vmem>>, vector<1x1x256xf32>,
    } else {
    }
    %c0_15 = arith.constant 0 : index
    %c0_16 = arith.constant 0 : index
    %c0_17 = arith.constant 0 : index
    %33 = vector.load %arg5[%c0_15, %c0_16, %c0_17] : memref<1x1x256xf32, #tpu.memory_space<vmem>>, vector<1x1x256xf32>
    %34 = arith.addf %33, %29 : vector<1x1x256xf32>
    %c0_18 = arith.constant 0 : index
    %c0_19 = arith.constant 0 : index
    %c0_20 = arith.constant 0 : index
    %35 = vector.load %arg5[%c0_18, %c0_19, %c0_20] : memref<1x1x256xf32, #tpu.memory_space<vmem>>, vector<1x1x256xf32>
    tpu.vector_store %arg5[%c0_18, %c0_19, %c0_20], %34 {strides = array<i32>} : memref<1x1x256xf32, #tpu.memory_space<vmem>>, vector<1x1x256xf32>,
    return
  }
  func.func @transform_0(%arg0: i32, %arg1: i32) -> (i32, i32, i32) {
    %c0_i32 = arith.constant 0 : i32
    %c0_i32_0 = arith.constant 0 : i32
    return %arg0, %c0_i32, %arg1 : i32, i32, i32
  }
  func.func @transform_1(%arg0: i32, %arg1: i32) -> (i32, i32, i32) {
    %c0_i32 = arith.constant 0 : i32
    %c0_i32_0 = arith.constant 0 : i32
    return %arg0, %c0_i32, %arg1 : i32, i32, i32
  }
  func.func @transform_2(%arg0: i32, %arg1: i32) -> (i32, i32, i32) {
    %c0_i32 = arith.constant 0 : i32
    %c0_i32_0 = arith.constant 0 : i32
    %c0_i32_1 = arith.constant 0 : i32
    %c0_i32_2 = arith.constant 0 : i32
    return %c0_i32, %c0_i32_0, %c0_i32_1 : i32, i32, i32
  }
  func.func @transform_3(%arg0: i32, %arg1: i32) -> (i32, i32, i32) {
    %c0_i32 = arith.constant 0 : i32
    %c0_i32_0 = arith.constant 0 : i32
    %c0_i32_1 = arith.constant 0 : i32
    return %arg0, %c0_i32, %c0_i32_0 : i32, i32, i32
  }
}

</mosaic_0001>

<bundles_post_ra>
// kernel: tpu_custom_call.1
= control target key start
LH: loop header
LB: loop body
LE: loop exit
PB: predicated region body
PF: predicated region fallthrough
CT: control target
= control target key end

     0   :  { %8 = vsyncpa [#allocation3], 0  ;;  %s944_s0 = inlined_call_operand.hbm [shape: f32[2,4,256], index: 0, kind: input, shape index: {}]   ;;  %s945_s1 = inlined_call_operand.vmem [shape: s32[2,1,256], index: 1, kind: input, shape index: {}]   ;;  %s946_s2 = inlined_call_operand.vmem [shape: f32[1,4,1], index: 2, kind: input, shape index: {}]   ;;  %s947_s3 = inlined_call_operand.hbm [shape: f32[2,1,256], index: 3, kind: output, shape index: {}]  }
   0x1   :  { %10 = vsyncpa [#allocation3 + $0x1], 0 }
   0x2   :  { %11 = vsyncpa [#allocation4], 0 }
   0x3   :  { %13 = vsyncpa [#allocation4 + $0x1], 0  ;;  %s718_s12 = smov 0   ;;  %s720_s13 = smov 0  }
   0x4   :  { %s722_s14 = smov 0   ;;  %s724_s15 = smov 0  }
   0x5   :  { %s726_s16 = smov 0   ;;  %s728_s17 = smov 0  }
   0x6 LB: > { %s488_s18 = sadd.s32 4294967295, %s691_s17   ;;  %s489_s19 = sadd.s32 4294967294, %s691_s17   ;;  %s691_s17 = sphi %s728_s17, %s19_s17   ;;  %s687_s16 = sphi %s726_s16, %s965_s16   ;;  %s683_s15 = sphi %s724_s15, %s964_s15   ;;  %s679_s14 = sphi %s722_s14, %s963_s14   ;;  %s675_s13 = sphi %s720_s13, %s962_s13   ;;  %s671_s12 = sphi %s718_s12, %s961_s12  }
   0x7   : > { %s31_s20 = sadd.s32 1, %s687_s16  ;;  %s40_s21 = sadd.s32 1, %s679_s14 }
   0x8   : > { %p33_p0 = scmp.ge.s32.totalorder %s31_s20, 2  ;;  %p47_p1 = scmp.ne.s32.totalorder %s679_s14, %s675_s13 }
   0x9   : > { %p48_p2 = scmp.eq.s32.totalorder %s691_s17, 0  ;;  %p53_p3 = scmp.ne.s32.totalorder %s675_s13, %s671_s12 }
   0xa   : > { %s967_s20 = smov (%p33_p0, %s31_s20), 0  ;;  %p54_p5 = scmp.eq.s32.totalorder %s488_s18, 0 }
   0xb   : > { %p759_p4 = por %p48_p2, %p47_p1  ;;  %s35_s23 = ssub.s32 %s687_s16, %s967_s20 }
   0xc   : > { %p126_p6 = scmp.eq.s32.totalorder %s488_s18, 1  ;;  %p38_p7 = scmp.eq.s32.totalorder %s35_s23, 0 }
   0xd   : > { %p765_p8 = por %p54_p5, %p53_p3  ;;  %p132_p10 = scmp.eq.s32.totalorder %s489_s19, 1 }
   0xe   : > { %p769_p9 = por %p126_p6, %p47_p1  ;;  %p518_p13 = scmp.lt.s32.totalorder %s691_s17, 2 }
   0xf   : > { %s774_s26 = scalar_select %p38_p7, %s679_s14, %s40_s21  }
  0x10   : > { %s951_s25 = scalar_select %p769_p9, 1, 0 }
  0x11   : > { %p776_p11 = por %p132_p10, %p53_p3  ;;  %s155_s28 = sand.u32 1, %s679_s14  }
  0x12   : > { %s492_s29 = sshll.u32 %s155_s28, 3  ;;  %s504_s30 = sshll.u32 %s687_s16, 7 }
  0x13   : > { %s952_s27 = scalar_select %p776_p11, 1, 0 }
  0x14   : > { %s787_s6 = scalar_lea.hbm %s944_s0, %s504_s30  ;;  %s159_s7 = scalar_lea.vmem [#allocation2], %s492_s29 }
  0x15   : > { %s169_s8 = sshll.u32 %s159_s7, 4  ;;  %p793_p0 = pnand %p518_p13, %p759_p4  ;;  %s789_s8 = int_to_ptr.vmem [resolvable:$true] %s169_s8 }
  0x16   : > { %s156_s10 = scalar_lea.sflag [#allocation3], %s155_s28  ;;  %s579_s11 = scalar_lea.hbm %s787_s6, 128 }
  0x17   : > { %p580_p3 = scmp.ne.s32.totalorder %s787_s6, %s579_s11  ;;  %p581_p5 = pneg %p793_p0 }
  0x18   : > { %s584_s21 = scalar_lea.hbm %s944_s0, 256  ;;  %p585_p4 = scmp.lt.u32.totalorder %s787_s6, %s944_s0 }
  0x19   : > { %p582_p6 = pnand %p581_p5, %p580_p3  ;;  %p586_p10 = scmp.lt.u32.totalorder %s584_s21, %s579_s11 }
  0x1a   : > { %p588_p12 = scmp.lt.u32.totalorder %s579_s11, %s787_s6 }
  0x1b   : > { %p583_p7 = pneg %p582_p6  ;;  %p587_p13 = por %p586_p10, %p585_p4 }
  0x1d   : > { %p589_p1 = por %p588_p12, %p587_p13 }
  0x1f   : > { %p590_p2 = pnand %p589_p1, %p583_p7 }
  0x21   : > { %593 = shalt.err (!%p590_p2)
}
  0x22   : > { %s594_s28 = scalar_lea.vmem %s789_s8, 128  ;;  %s693_s29 = smov [#allocation2]  }
  0x23   : > { %p595_p3 = scmp.ne.s32.totalorder %s789_s8, %s594_s28  ;;  %s599_s30 = sshll.u32 %s693_s29, 4  ;;  %s600_s30 = int_to_ptr.vmem [resolvable:$false] %s599_s30 }
  0x24   : > { %s601_s4 = scalar_lea.vmem %s600_s30, 256  ;;  %p602_p9 = scmp.lt.s32.totalorder %s789_s8, %s600_s30 }
  0x25   : > { %p597_p6 = pnand %p595_p3, %p581_p5  ;;  %p603_p4 = scmp.lt.s32.totalorder %s601_s4, %s594_s28 }
  0x27   : > { %p598_p11 = pneg %p597_p6  ;;  %p604_p10 = por %p603_p4, %p602_p9 }
  0x29   : > { %p605_p12 = pnand %p604_p10, %p598_p11 }
  0x2b   : > { %608 = shalt.err (!%p605_p12)
}
  0x2c   : > { %513 = dma.hbm_to_vmem [thread:$0]  (!%p793_p0), %s787_s6, 128, %s789_s8, %s156_s10  }
  0x2d   : > { %p954_p1 = scmp.lt.s32.totalorder %s691_s17, 3  ;;  %p955_p2 = scmp.ge.s32.totalorder %s691_s17, 1 }
  0x2f   : > { %p187_p5 = pnand %p955_p2, %p954_p1 }
  0x30   : > { %s829_s5 = sand.u32 (!%p187_p5), 1, %s675_s13  }
  0x31   : > { %190 = sbr.rel (%p187_p5) target bundleno = 225 (0xe1), region = 32  ;;  %s496_s7 = sshll.u32 (!%p187_p5), %s829_s5, 3 }
  0x32   : > { %s193_s11 = scalar_lea.sflag (!%p187_p5), [#allocation3], %s829_s5  ;;  %s196_s18 = scalar_lea.vmem (!%p187_p5), [#allocation2], %s496_s7 }
  0x38   : > { %662 = dma.done.wait (%p765_p8), %s193_s11, 128  }
  0x39   : > { %664 = vsyncadd (%p765_p8), %s193_s11, 4294967168  ;;  %v694_v0 = vmov 0   ;;  %v239_v1 = vld [vmem:[%s946_s2] sm:$0xf]  ;;  %v288_v2 = vlaneseq  ;;  %s497_s9 = sshll.u32 %s829_s5, 1  ;;  %v695_v4 = vmov 0.0  }
  0x3a   : > { %571 = vset.pattern.permute.xlu0 %v694_v0  ;;  %s845_s10 = scalar_lea.vmem [#allocation5], %s497_s9  ;;  %v237_v5 = vld [vmem:[%s196_s18] sm:$0xff]  ;;  %vm243_vm1 = vcmask 1043456   ;;  %p229_p8 = scmp.lt.s32.totalorder %s683_s15, 1 }
  0x3b   : > { %318 = vperm.xlu0 %571, %v239_v1   ;;  %vm841_vm0 = vcmp.lt.s32.totalorder %v288_v2, 256  ;;  %v241_v6 = vcombine.high %v237_v5, %v237_v5  ;;  %v244_v7 = vsel %vm243_vm1, %v237_v5, -inf  ;;  %v862_v28 = vshrl.u32 %v288_v2, 7  ;;  %s505_s28 = sshll.u32 %s683_s15, 5  ;;  %s392_s29 = sshll.u32 %s845_s10, 4  ;;  %s894_s29 = int_to_ptr.vmem [resolvable:$true] %s392_s29 }
  0x3c   : > { %351 = vst.msk [vmem:[%s845_s10] sm:$0x3] %vm841_vm0, %v695_v4  ;;  %v245_v9 = vrot.slane %v244_v7, 4  ;;  %s230_s24 = scalar_select %p229_p8, %s683_s15, 1 }
  0x3d   : > { %v251_v8 = vsel %vm243_vm1, %v241_v6, -inf  ;;  %v292_v31 = vsub.s32 0, %v862_v28  ;;  %v296_v32 = vsub.s32 1, %v862_v28  ;;  %s892_s7 = scalar_lea.hbm %s947_s3, %s505_s28  ;;  %s378_s11 = scalar_lea.sflag [#allocation4], %s829_s5 }
  0x3e   : > { %v252_v10 = vrot.slane %v251_v8, 4  ;;  %v246_v11 = vmax.f32 %v244_v7, %v245_v9  ;;  %s498_s19 = sshll.u32 %s230_s24, 1  ;;  %s609_s18 = scalar_lea.vmem %s894_s29, 32 }
  0x3f   : > { %s235_s23 = scalar_lea.vmem %s945_s1, %s498_s19  ;;  %p610_p9 = scmp.ne.s32.totalorder %s894_s29, %s609_s18 }
  0x40   : > { %v253_v12 = vmax.f32 %v251_v8, %v252_v10  ;;  %v247_v13 = vrot.slane %v246_v11, 2  ;;  %v238_v34 = vld [vmem:[%s235_s23] sm:$0x3]  ;;  %v696_v10 = vmov 1966171168   ;;  %p958_p11 = scmp.ne.s32.totalorder %s951_s25, 0 }
  0x41   : > { %v293_v37 = vrot.slane %v238_v34, %v292_v31  ;;  %v297_v38 = vrot.slane %v238_v34, %v296_v32  ;;  %s697_s15 = smov [#allocation5]  }
  0x42   : > { %v254_v14 = vrot.slane %v253_v12, 2  ;;  %v248_v15 = vmax.f32 %v246_v11, %v247_v13  ;;  %v357_v11 = vunpack.c.l.s4 %v696_v10  ;;  %p611_p0 = pnand %p610_p9, %p958_p11  ;;  %s613_s6 = sshll.u32 %s697_s15, 4  ;;  %s614_s6 = int_to_ptr.vmem [resolvable:$false] %s613_s6 }
  0x43   : > { %vm298_vm2 = vcmp.eq.s32.totalorder %v293_v37, %v862_v28  ;;  %vm299_vm3 = vcmp.eq.s32.totalorder %v297_v38, %v862_v28  ;;  %s615_s8 = scalar_lea.vmem %s614_s6, 64  ;;  %p616_p13 = scmp.lt.s32.totalorder %s894_s29, %s614_s6 }
  0x44   : > { %v255_v16 = vmax.f32 %v253_v12, %v254_v14  ;;  %v249_v17 = vrot.slane %v248_v15, 1  ;;  %v300_v42 = vsel %vm298_vm2, %v237_v5, 0.0  ;;  %v301_v43 = vsel %vm299_vm3, %v241_v6, 0.0  ;;  %p612_p7 = pneg %p611_p0  ;;  %p617_p3 = scmp.lt.s32.totalorder %s615_s8, %s609_s18 }
  0x45   : > { %v302_v46 = vsel %vm243_vm1, %v300_v42, 0.0  ;;  %v309_v47 = vsel %vm243_vm1, %v301_v43, 0.0 }
  0x46   : > { %v256_v18 = vrot.slane %v255_v16, 1  ;;  %v852_v19 = vmax.f32 %v248_v15, %v249_v17  ;;  %v303_v50 = vrot.slane %v302_v46, 4  ;;  %v310_v51 = vrot.slane %v309_v47, 4  ;;  %p618_p6 = por %p617_p3, %p616_p13 }
  0x48   : > { %v854_v20 = vmax.f32 %v255_v16, %v256_v18  ;;  %v304_v52 = vadd.f32 %v303_v50, %v302_v46  ;;  %v311_v53 = vadd.f32 %v310_v51, %v309_v47  ;;  %p619_p4 = pnand %p618_p6, %p612_p7 }
  0x4a   : > { %v260_v21 = vcombine.low %v852_v19, %v854_v20  ;;  %v305_v54 = vrot.slane %v304_v52, 2  ;;  %v312_v55 = vrot.slane %v311_v53, 2 }
  0x4c   : > { %v262_v22 = vsub.f32 %v237_v5, %v260_v21  ;;  %v306_v56 = vadd.f32 %v305_v54, %v304_v52  ;;  %v313_v57 = vadd.f32 %v312_v55, %v311_v53 }
  0x4e   : > { %v263_v23 = vmul.f32 1.442695, %v262_v22  ;;  %v307_v63 = vrot.slane %v306_v56, 1  ;;  %v314_v0 = vrot.slane %v313_v57, 1  ;;  %v358_v22 = vunpack.c.0.s8 %v357_v11 }
  0x50   : > { %573 = vpow2.f32 %v263_v23  ;;  %v308_v12 = vadd.f32 %v307_v63, %v306_v56  ;;  %v315_v13 = vadd.f32 %v314_v0, %v313_v57 }
  0x5a   : > { %v574_v24 = vpop.eup %573 }
  0x5b   : > { %v266_v25 = vcombine.high %v574_v24, %v574_v24  ;;  %v268_v26 = vsel %vm243_vm1, %v574_v24, 0.0 }
  0x5c   : > { %v269_v29 = vrot.slane %v268_v26, 4 }
  0x5d   : > { %v275_v27 = vsel %vm243_vm1, %v266_v25, 0.0 }
  0x5e   : > { %v276_v30 = vrot.slane %v275_v27, 4  ;;  %v270_v33 = vadd.f32 %v269_v29, %v268_v26 }
  0x60   : > { %v277_v35 = vadd.f32 %v276_v30, %v275_v27  ;;  %v271_v36 = vrot.slane %v270_v33, 2 }
  0x62   : > { %v278_v39 = vrot.slane %v277_v35, 2  ;;  %v272_v40 = vadd.f32 %v271_v36, %v270_v33  ;;  %v352_v33 = vld [vmem:[%s845_s10] sm:$0x3] }
  0x64   : > { %v279_v41 = vadd.f32 %v278_v39, %v277_v35  ;;  %v273_v44 = vrot.slane %v272_v40, 1 }
  0x66   : > { %v280_v45 = vrot.slane %v279_v41, 1  ;;  %v274_v48 = vadd.f32 %v273_v44, %v272_v40 }
  0x68   : > { %v281_v49 = vadd.f32 %v280_v45, %v279_v41  ;;  %575 = vlog2.f32 %v274_v48 }
  0x6a   : > { %577 = vlog2.f32 %v281_v49 }
  0x72   : > { %v576_v58 = vpop.eup %575 }
  0x73   : > { %v283_v4 = vmul.f32 0.6931472, %v576_v58 }
  0x74   : > { %v578_v59 = vpop.eup %577 }
  0x75   : > { %v285_v5 = vmul.f32 0.6931472, %v578_v59  ;;  %v286_v14 = vadd.f32 %v283_v4, %v852_v19  ;;  %v361_v19 = vsub.s32 %v358_v22, %v862_v28 }
  0x77   : > { %v287_v15 = vadd.f32 %v285_v5, %v854_v20  ;;  %v337_v25 = vsub.f32 %v286_v14, %v308_v12 }
  0x79   : > { %v338_v26 = vsub.f32 %v287_v15, %v315_v13 }
  0xba   : > { %v319_v60 = vpop.permute.xlu0 %318 }
  0xbb   : > { %v321_v61 = vsel %vm298_vm2, %v319_v60, 0.0  ;;  %v322_v62 = vsel %vm299_vm3, %v319_v60, 0.0 }
  0xbc   : > { %v323_v1 = vsel %vm243_vm1, %v321_v61, 0.0  ;;  %v330_v2 = vsel %vm243_vm1, %v322_v62, 0.0 }
  0xbd   : > { %v324_v6 = vrot.slane %v323_v1, 4  ;;  %v331_v7 = vrot.slane %v330_v2, 4 }
  0xbf   : > { %v325_v8 = vadd.f32 %v324_v6, %v323_v1  ;;  %v332_v9 = vadd.f32 %v331_v7, %v330_v2 }
  0xc1   : > { %v326_v16 = vrot.slane %v325_v8, 2  ;;  %v333_v17 = vrot.slane %v332_v9, 2 }
  0xc3   : > { %v327_v18 = vadd.f32 %v326_v16, %v325_v8  ;;  %v334_v21 = vadd.f32 %v333_v17, %v332_v9 }
  0xc5   : > { %v328_v23 = vrot.slane %v327_v18, 1  ;;  %v335_v24 = vrot.slane %v334_v21, 1 }
  0xc7   : > { %v329_v27 = vadd.f32 %v328_v23, %v327_v18  ;;  %v336_v29 = vadd.f32 %v335_v24, %v334_v21 }
  0xc9   : > { %v339_v20 = vmul.f32 %v337_v25, %v329_v27  ;;  %v340_v30 = vmul.f32 %v338_v26, %v336_v29 }
  0xcb   : > { %v355_v31 = vcombine.low %v339_v20, %v340_v30 }
  0xcd   : > { %v362_v32 = vrot.slane %v355_v31, %v361_v19 }
  0xcf   : > { %v369_v34 = vrot.slane %v362_v32, %v361_v19 }
  0xd1   : > { %v371_v35 = vadd.f32 %v369_v34, %v352_v33 }
  0xd3   : > { %376 = vst.msk [vmem:[%s845_s10] sm:$0x3] %vm841_vm0, %v371_v35 }
  0xd4   : > { %622 = shalt.err (!%p619_p4)
}
  0xd5   : > { %s623_s5 = scalar_lea.hbm %s892_s7, 32  ;;  %s627_s24 = scalar_lea.hbm %s947_s3, 64 }
  0xd6   : > { %p624_p10 = scmp.ne.s32.totalorder %s892_s7, %s623_s5  ;;  %p628_p2 = scmp.lt.u32.totalorder %s892_s7, %s947_s3 }
  0xd7   : > { %p629_p5 = scmp.lt.u32.totalorder %s627_s24, %s623_s5  ;;  %p631_p9 = scmp.lt.u32.totalorder %s623_s5, %s892_s7 }
  0xd8   : > { %p625_p12 = pnand %p624_p10, %p958_p11 }
  0xd9   : > { %p630_p8 = por %p629_p5, %p628_p2 }
  0xda   : > { %p626_p1 = pneg %p625_p12 }
  0xdb   : > { %p632_p0 = por %p631_p9, %p630_p8 }
  0xdd   : > { %p633_p7 = pnand %p632_p0, %p626_p1 }
  0xdf   : > { %636 = shalt.err (!%p633_p7)
}
  0xe0   : > { %508 = dma.vmem_to_hbm [thread:$0]  (%p958_p11), %s894_s29, 32, %s892_s7, %s378_s11  }
  0xe1 PF: > { %s404_s22 = sand.u32 1, %s671_s12   ;;  %p959_p13 = scmp.ne.s32.totalorder %s952_s27, 0 }
  0xe2   : > { %p960_p3 = scmp.ge.s32.totalorder %s691_s17, 2  ;;  %s405_s23 = scalar_lea.sflag [#allocation4], %s404_s22 }
  0xe4   : > { %p515_p6 = pnand %p960_p3, %p959_p13 }
  0xe6   : > { %666 = dma.done.wait (!%p515_p6), %s405_s23, 32  }
  0xe7   : > { %668 = vsyncadd (!%p515_p6), %s405_s23, 4294967264  ;;  %s19_s17 = sadd.s32 1, %s691_s17   ;;  %s961_s12 = smov %s675_s13 }
  0xe8   : > { %p16_p4 = scmp.ge.s32.totalorder %s19_s17, 4   ;;  %s962_s13 = smov %s679_s14 }
  0xe9   : > { %s963_s14 = smov %s774_s26  ;;  %s964_s15 = smov %s687_s16 }
  0xea   : > { %s965_s16 = smov %s967_s20  ;;  %18 = sbr.rel (!%p16_p4) target bundleno = 6 (0x6), region = 84 }
  0xf1   :  { %410 = vsyncpa [#allocation3], 1 }
  0xf2   :  { %412 = vsyncpa [#allocation3 + $0x1], 1 }
  0xf3   :  { %413 = vsyncpa [#allocation4], 1 }
  0xf4   :  { %415 = vsyncpa [#allocation4 + $0x1], 1 }

</bundles_post_ra>
